<compile_context>
chip_gen: v5e
topology: v5e:2x2
jax: 0.10.0
libtpu: 0.0.40
codegen_flags: <defaults>
</compile_context>

<pallas_src>
import functools

import jax
import jax.numpy as jnp
from jax import lax
from jax.experimental import pallas as pl
from jax.experimental.pallas import tpu as pltpu


def _head_kernel(x_ref, wqkv_ref, bqkv_ref, o_ref):
    Bt, T, H = x_ref.shape
    P = wqkv_ref.shape[-1] // 3          # lane-padded projection width (>= H)

    # ---- fused K/Q/V projection: bf16 MXU, f32 accumulate ----
    x2 = x_ref[...].reshape(Bt * T, H)                       # bf16
    qkv = jnp.dot(x2, wqkv_ref[...],
                  preferred_element_type=jnp.float32)        # (Bt*T, 3P) f32
    qkv = (qkv + bqkv_ref[...]).astype(jnp.bfloat16)         # padded lanes stay 0

    # Tile-aligned slices: each projection sits on its own 128-lane tile.
    k = qkv[:, 0 * P:1 * P].reshape(Bt, T, P)
    q = qkv[:, 1 * P:2 * P].reshape(Bt, T, P)
    v = qkv[:, 2 * P:3 * P].reshape(Bt, T, P)

    # ---- attention scores: batched q @ k^T (transpose folded into the dot;
    # zero-padded lanes contribute 0 to the contraction) ----
    scores = lax.dot_general(
        q, k, dimension_numbers=(((2,), (2,)), ((0,), (0,))),
        preferred_element_type=jnp.float32)                  # (Bt, T, T) f32

    # ---- causal softmax (f32).  softmax over the allowed set is invariant to
    # the shared row max, so take the max over the full row and zero the
    # masked probabilities after the exp — no -inf-masked scores copy. ----
    row = lax.broadcasted_iota(jnp.int32, (T, T), 0)
    col = lax.broadcasted_iota(jnp.int32, (T, T), 1)
    causal = (col <= row)[None, :, :]

    m = jnp.max(scores, axis=-1, keepdims=True)
    p = jnp.exp(scores - m)
    p = jnp.where(causal, p, 0.0)
    denom = jnp.sum(p, axis=-1, keepdims=True)
    probs = (p * pl.reciprocal(denom, approx=True)).astype(jnp.bfloat16)

    # ---- probs @ v (bf16 MXU, f32 accumulate) ----
    out = lax.dot_general(
        probs, v, dimension_numbers=(((2,), (1,)), ((0,), (0,))),
        preferred_element_type=jnp.float32)                  # (Bt, T, P) f32

    o_ref[...] = out[:, :, :H].astype(o_ref.dtype)


def _largest_divisor_leq(n, cap):
    for d in range(min(n, cap), 0, -1):
        if n % d == 0:
            return d
    return 1


def _pick_batch_block(B, batch_block):
    # Keep >= 2 grid steps whenever B >= 2 so both v7x TensorCores get work
    # under dimension_semantics=("parallel",).  (Moot on v5e/v6e: 1 TC.)
    cap = batch_block if B < 2 else max(1, min(batch_block, B // 2))
    return _largest_divisor_leq(B, cap)


@functools.partial(jax.jit, static_argnames=("batch_block",))
def head_forward(x, wk, bk, wq, bq, wv, bv, *, batch_block=8):
    """Single-head causal self-attention forward (matches PyTorch `Head`).

    x:            (B, T, H) float32
    wk/wq/wv:     (H, H)  PyTorch nn.Linear weights (out_features, in_features)
    bk/bq/bv:     (H,)    biases
    """
    B, T, H = x.shape
    out_dtype = x.dtype
    P = ((H + 127) // 128) * 128      # round projection width up to a lane tile

    def pad_wt(w):   # (out, in) -> W^T zero-padded to (in, P)
        return jnp.pad(w.T.astype(jnp.float32), ((0, 0), (0, P - H)))

    def pad_b(b):
        return jnp.pad(b.astype(jnp.float32), (0, P - H))

    wqkv = jnp.concatenate([pad_wt(wk), pad_wt(wq), pad_wt(wv)], axis=1)  # (H, 3P)
    wqkv = wqkv.astype(jnp.bfloat16)
    bqkv = jnp.concatenate([pad_b(bk), pad_b(bq), pad_b(bv)])[None, :]    # (1, 3P) f32

    x_bf = x.astype(jnp.bfloat16)     # halve x HBM traffic into the kernel

    Bt = _pick_batch_block(B, batch_block)

    return pl.pallas_call(
        _head_kernel,
        out_shape=jax.ShapeDtypeStruct((B, T, H), out_dtype),
        grid_spec=pltpu.PrefetchScalarGridSpec(
            num_scalar_prefetch=0,
            grid=(B // Bt,),
            in_specs=[
                pl.BlockSpec((Bt, T, H), lambda b: (b, 0, 0)),      # x (bf16)
                pl.BlockSpec((H, 3 * P), lambda b: (0, 0)),         # fused W^T (bf16)
                pl.BlockSpec((1, 3 * P), lambda b: (0, 0)),         # fused bias (f32)
            ],
            out_specs=pl.BlockSpec((Bt, T, H), lambda b: (b, 0, 0)),
        ),
        compiler_params=pltpu.CompilerParams(
            dimension_semantics=("parallel",),      # batch axis -> megacore
            vmem_limit_bytes=48 * 1024 * 1024,
        ),
    )(x_bf, wqkv, bqkv)


def head_reference(x, wk, bk, wq, bq, wv, bv):
    """Pure-JAX f32 reference mirroring the PyTorch forward exactly."""
    k = x @ wk.T + bk
    q = x @ wq.T + bq
    v = x @ wv.T + bv
    scores = jnp.einsum("btd,bsd->bts", q, k)
    T = x.shape[1]
    mask = jnp.tril(jnp.ones((T, T), dtype=bool))
    scores = jnp.where(mask, scores, -jnp.inf)
    probs = jax.nn.softmax(scores, axis=-1)
    return jnp.einsum("bts,bsd->btd", probs, v)


if __name__ == "__main__":
    B, T, H = 2, 8, 32   # small test shapes; real training uses T == block_size == 256

    key = jax.random.PRNGKey(0)
    kx, kk, kbk, kq, kbq, kv, kbv = jax.random.split(key, 7)

    x = jax.random.normal(kx, (B, T, H), dtype=jnp.float32)

    # nn.Linear(head_size, head_size): weight (H, H), bias (H,)
    bound = 1.0 / jnp.sqrt(H)
    wk = jax.random.uniform(kk, (H, H), minval=-bound, maxval=bound, dtype=jnp.float32)
    bk = jax.random.uniform(kbk, (H,), minval=-bound, maxval=bound, dtype=jnp.float32)
    wq = jax.random.uniform(kq, (H, H), minval=-bound, maxval=bound, dtype=jnp.float32)
    bq = jax.random.uniform(kbq, (H,), minval=-bound, maxval=bound, dtype=jnp.float32)
    wv = jax.random.uniform(kv, (H, H), minval=-bound, maxval=bound, dtype=jnp.float32)
    bv = jax.random.uniform(kbv, (H,), minval=-bound, maxval=bound, dtype=jnp.float32)

    out = head_forward(x, wk, bk, wq, bq, wv, bv)
    out = jax.block_until_ready(out)

    ref = head_reference(x, wk, bk, wq, bq, wv, bv)
    assert out.shape == (B, T, H)
    # Tolerance accommodates bf16 MXU inputs + approx reciprocal in the softmax.
    max_err = float(jnp.max(jnp.abs(out - ref)))
    assert jnp.allclose(out, ref, atol=3e-2, rtol=3e-2), (
        f"mismatch vs reference (max abs err {max_err})")

    print("KERNEL_OK")
</pallas_src>

<mosaic_0001>
module attributes {stable_mosaic.version = 11 : i64} {
  func.func @_head_kernel(%arg0: i32, %arg1: memref<1x8x32xbf16, #tpu.memory_space<vmem>>, %arg2: memref<32x384xbf16, #tpu.memory_space<vmem>>, %arg3: memref<1x384xf32, #tpu.memory_space<vmem>>, %arg4: memref<1x8x32xf32, #tpu.memory_space<vmem>>) attributes {dimension_semantics = [#tpu.dimension_semantics<parallel>], iteration_bounds = array<i64: 2>, scalar_prefetch = 0 : i64, scratch_operands = 0 : i64, tpu.core_type = #tpu.core_type<tc>, window_params = [{transform_indices = @transform_0, window_bounds = array<i64: 1, 8, 32>}, {pipeline_mode = #tpu.pipeline_mode<synchronous>, transform_indices = @transform_1, window_bounds = array<i64: 32, 384>}, {pipeline_mode = #tpu.pipeline_mode<synchronous>, transform_indices = @transform_2, window_bounds = array<i64: 1, 384>}, {transform_indices = @transform_3, window_bounds = array<i64: 1, 8, 32>}]} {
    %c0 = arith.constant 0 : index
    %c0_0 = arith.constant 0 : index
    %c0_1 = arith.constant 0 : index
    %0 = vector.load %arg1[%c0, %c0_0, %c0_1] : memref<1x8x32xbf16, #tpu.memory_space<vmem>>, vector<1x8x32xbf16>
    %1 = vector.shape_cast %0 : vector<1x8x32xbf16> to vector<8x32xbf16>
    %c0_2 = arith.constant 0 : index
    %c0_3 = arith.constant 0 : index
    %2 = vector.load %arg2[%c0_2, %c0_3] : memref<32x384xbf16, #tpu.memory_space<vmem>>, vector<32x384xbf16>
    %cst = arith.constant dense<0.000000e+00> : vector<8x384xf32>
    %3 = tpu.matmul %1, %2, %cst {dimension_numbers = #tpu.dot_dimension_numbers<[1], [0], [0], [1], [0, 0, 1, 1], [], []>} : vector<8x32xbf16>, vector<32x384xbf16>, vector<8x384xf32> -> vector<8x384xf32>
    %c0_4 = arith.constant 0 : index
    %c0_5 = arith.constant 0 : index
    %4 = vector.load %arg3[%c0_4, %c0_5] : memref<1x384xf32, #tpu.memory_space<vmem>>, vector<1x384xf32>
    %5 = vector.broadcast %4 : vector<1x384xf32> to vector<8x384xf32>
    %6 = arith.addf %3, %5 : vector<8x384xf32>
    %7 = arith.truncf %6 : vector<8x384xf32> to vector<8x384xbf16>
    %8 = vector.extract_strided_slice %7 {offsets = [0, 0], sizes = [8, 128], strides = [1, 1]} : vector<8x384xbf16> to vector<8x128xbf16>
    %9 = vector.shape_cast %8 : vector<8x128xbf16> to vector<1x8x128xbf16>
    %10 = vector.extract_strided_slice %7 {offsets = [0, 128], sizes = [8, 128], strides = [1, 1]} : vector<8x384xbf16> to vector<8x128xbf16>
    %11 = vector.shape_cast %10 : vector<8x128xbf16> to vector<1x8x128xbf16>
    %12 = vector.extract_strided_slice %7 {offsets = [0, 256], sizes = [8, 128], strides = [1, 1]} : vector<8x384xbf16> to vector<8x128xbf16>
    %13 = vector.shape_cast %12 : vector<8x128xbf16> to vector<1x8x128xbf16>
    %cst_6 = arith.constant dense<0.000000e+00> : vector<1x8x8xf32>
    %14 = tpu.matmul %11, %9, %cst_6 {dimension_numbers = #tpu.dot_dimension_numbers<[2], [2], [1], [1], [0, 0, 0, 1, 1, 1], [0], [0]>} : vector<1x8x128xbf16>, vector<1x8x128xbf16>, vector<1x8x8xf32> -> vector<1x8x8xf32>
    %15 = tpu.iota {dimensions = array<i32: 0>} : vector<8x8xi32>
    %16 = tpu.iota {dimensions = array<i32: 1>} : vector<8x8xi32>
    %17 = arith.cmpi sle, %16, %15 : vector<8x8xi32>
    %18 = vector.shape_cast %17 : vector<8x8xi1> to vector<1x8x8xi1>
    %cst_7 = arith.constant dense<0xFF800000> : vector<1x8xf32>
    %19 = vector.multi_reduction <maximumf>, %14, %cst_7 [2] : vector<1x8x8xf32> to vector<1x8xf32>
    %20 = vector.shape_cast %19 : vector<1x8xf32> to vector<1x8x1xf32>
    %21 = vector.broadcast %20 : vector<1x8x1xf32> to vector<1x8x8xf32>
    %22 = arith.subf %14, %21 : vector<1x8x8xf32>
    %23 = math.exp %22 : vector<1x8x8xf32>
    %cst_8 = arith.constant 0.000000e+00 : f32
    %24 = vector.broadcast %cst_8 : f32 to vector<1x8x8xf32>
    %25 = arith.select %18, %23, %24 : vector<1x8x8xi1>, vector<1x8x8xf32>
    %cst_9 = arith.constant dense<0.000000e+00> : vector<1x8xf32>
    %26 = vector.multi_reduction <add>, %25, %cst_9 [2] : vector<1x8x8xf32> to vector<1x8xf32>
    %27 = vector.shape_cast %26 : vector<1x8xf32> to vector<1x8x1xf32>
    %28 = tpu.reciprocal %27 {approx = true} : vector<1x8x1xf32> -> vector<1x8x1xf32>
    %29 = vector.broadcast %28 : vector<1x8x1xf32> to vector<1x8x8xf32>
    %30 = arith.mulf %25, %29 : vector<1x8x8xf32>
    %31 = arith.truncf %30 : vector<1x8x8xf32> to vector<1x8x8xbf16>
    %cst_10 = arith.constant dense<0.000000e+00> : vector<1x8x128xf32>
    %32 = tpu.matmul %31, %13, %cst_10 {dimension_numbers = #tpu.dot_dimension_numbers<[2], [1], [1], [2], [0, 0, 0, 1, 1, 2], [0], [0]>} : vector<1x8x8xbf16>, vector<1x8x128xbf16>, vector<1x8x128xf32> -> vector<1x8x128xf32>
    %33 = vector.extract_strided_slice %32 {offsets = [0, 0, 0], sizes = [1, 8, 32], strides = [1, 1, 1]} : vector<1x8x128xf32> to vector<1x8x32xf32>
    %c0_11 = arith.constant 0 : index
    %c0_12 = arith.constant 0 : index
    %c0_13 = arith.constant 0 : index
    %34 = vector.load %arg4[%c0_11, %c0_12, %c0_13] : memref<1x8x32xf32, #tpu.memory_space<vmem>>, vector<1x8x32xf32>
    tpu.vector_store %arg4[%c0_11, %c0_12, %c0_13], %33 {strides = array<i32>} : memref<1x8x32xf32, #tpu.memory_space<vmem>>, vector<1x8x32xf32>,
    return
  }
  func.func @transform_0(%arg0: i32) -> (i32, i32, i32) {
    %c0_i32 = arith.constant 0 : i32
    %c0_i32_0 = arith.constant 0 : i32
    %c0_i32_1 = arith.constant 0 : i32
    return %arg0, %c0_i32, %c0_i32_0 : i32, i32, i32
  }
  func.func @transform_1(%arg0: i32) -> (i32, i32) {
    %c0_i32 = arith.constant 0 : i32
    %c0_i32_0 = arith.constant 0 : i32
    %c0_i32_1 = arith.constant 0 : i32
    return %c0_i32, %c0_i32_0 : i32, i32
  }
  func.func @transform_2(%arg0: i32) -> (i32, i32) {
    %c0_i32 = arith.constant 0 : i32
    %c0_i32_0 = arith.constant 0 : i32
    %c0_i32_1 = arith.constant 0 : i32
    return %c0_i32, %c0_i32_0 : i32, i32
  }
  func.func @transform_3(%arg0: i32) -> (i32, i32, i32) {
    %c0_i32 = arith.constant 0 : i32
    %c0_i32_0 = arith.constant 0 : i32
    %c0_i32_1 = arith.constant 0 : i32
    return %arg0, %c0_i32, %c0_i32_0 : i32, i32, i32
  }
}

</mosaic_0001>

<bundles_post_ra>
// kernel: head_forward.1
= control target key start
LH: loop header
LB: loop body
LE: loop exit
PB: predicated region body
PF: predicated region fallthrough
CT: control target
= control target key end

     0   :  { %8 = vsyncpa [#allocation3], 0  ;;  %s694_s0 = inlined_call_operand.vmem [shape: bf16[2,8,32], index: 0, kind: input, shape index: {}]   ;;  %s695_s1 = inlined_call_operand.vmem [shape: bf16[32,384], index: 1, kind: input, shape index: {}]   ;;  %s696_s2 = inlined_call_operand.vmem [shape: f32[1,384], index: 2, kind: input, shape index: {}]   ;;  %s697_s3 = inlined_call_operand.hbm [shape: f32[2,8,32], index: 3, kind: output, shape index: {}]  }
   0x1   :  { %10 = vsyncpa [#allocation3 + $0x1], 0  ;;  %s563_s12 = smov 0   ;;  %s565_s13 = smov 0  }
   0x2   :  { %s567_s14 = smov 0   ;;  %s569_s15 = smov 0  }
   0x3 LB: > { %s584_s16 = sadd.s32 4294967295, %s541_s15   ;;  %s392_s17 = sadd.s32 4294967294, %s541_s15   ;;  %s541_s15 = sphi %s569_s15, %s703_s15   ;;  %s537_s14 = sphi %s567_s14, %s702_s14   ;;  %s533_s13 = sphi %s565_s13, %s701_s13   ;;  %s529_s12 = sphi %s563_s12, %s700_s12  }
   0x4   : > { %s588_s18 = sadd.s32 1, %s541_s15   ;;  %s91_s19 = sadd.s32 1, %s537_s14 }
   0x5   : > { %s88_s20 = ssub.s32 %s541_s15, %s588_s18  ;;  %p101_p0 = scmp.ne.s32.totalorder %s537_s14, %s533_s13 }
   0x6   : > { %p89_p1 = scmp.eq.s32.totalorder %s88_s20, 0  ;;  %p102_p2 = scmp.eq.s32.totalorder %s584_s16, 1 }
   0x7   : > { %p107_p3 = scmp.ne.s32.totalorder %s533_s13, %s529_s12  ;;  %p108_p4 = scmp.eq.s32.totalorder %s392_s17, 1 }
   0x8   : > { %s599_s21 = scalar_select %p89_p1, %s537_s14, %s91_s19  }
   0x9   : > { %p601_p5 = por %p102_p2, %p101_p0  ;;  %p605_p6 = por %p108_p4, %p107_p3 }
   0xa   : > { %p395_p7 = scmp.ge.s32.totalorder %s541_s15, 1  ;;  %p139_p8 = scmp.lt.s32.totalorder %s541_s15, 3 }
   0xc   : > { %p140_p9 = pnand %p395_p7, %p139_p8 }
   0xd   : > { %p162_p10 = scmp.lt.s32.totalorder (!%p140_p9), %s584_s16, 1  ;;  %s159_s10 = sand.u32 (!%p140_p9), 1, %s533_s13  }
   0xe   : > { %143 = sbr.rel (%p140_p9) target bundleno = 690 (0x2b2), region = 32  ;;  %s427_s11 = sshll.u32 (!%p140_p9), %s584_s16, 3 }
   0xf   : > { %s396_s17 = sshll.u32 (!%p140_p9), %s159_s10, 3  ;;  %s328_s24 = scalar_lea.hbm (!%p140_p9), %s697_s3, %s427_s11 }
  0x10   : > { %s161_s25 = scalar_lea.vmem (!%p140_p9), [#allocation2], %s396_s17  ;;  %s332_s27 = sshll.u32 (!%p140_p9), %s328_s24, 4  ;;  %s333_s27 = int_to_ptr.hbm [resolvable:$true] %s332_s27 }
  0x11   : > { %s318_s28 = scalar_lea.sflag (!%p140_p9), [#allocation3], %s159_s10  ;;  %s493_s29 = sshra.s32 (!%p140_p9), %s333_s27, 4  ;;  %s494_s29 = int_to_ptr.hbm [resolvable:$true] %s493_s29 }
  0x12   : > { %s495_s30 = scalar_lea.hbm (!%p140_p9), %s494_s29, 8  ;;  %s499_s5 = scalar_lea.hbm (!%p140_p9), %s697_s3, 16 }
  0x13   : > { %v412_v0 = vld [vmem:[%s695_s1 + $0x18] sm:$0xf]  ;;  %v434_v1 = vld [vmem:[%s695_s1 + $0x20] sm:$0xf0]  ;;  %v433_v2 = vld [vmem:[%s695_s1 + $0x1c] sm:$0xf]  ;;  %v277_v37 = vlaneseq  ;;  %p496_p11 = scmp.ne.s32.totalorder %s494_s29, %s495_s30  ;;  %p500_p0 = scmp.lt.s32.totalorder %s494_s29, %s697_s3 }
  0x14   : > { %v413_v3 = vor.u32 %v434_v1, %v412_v0  ;;  %v414_v4 = vld [vmem:[%s695_s1 + $0x24] sm:$0xf0]  ;;  %v400_v5 = vld [vmem:[%s695_s1] sm:$0xf]  ;;  %v431_v6 = vld [vmem:[%s695_s1 + $0x8] sm:$0xf0]  ;;  %p501_p1 = scmp.lt.s32.totalorder %s499_s5, %s495_s30 }
  0x15   : > { %v417_v7 = vor.u32 %v433_v2, %v414_v4  ;;  %v430_v8 = vld [vmem:[%s695_s1 + $0x4] sm:$0xf]  ;;  %v402_v9 = vld [vmem:[%s695_s1 + $0xc] sm:$0xf0]  ;;  %v401_v10 = vor.u32 %v431_v6, %v400_v5  ;;  %s163_s19 = scalar_select %p162_p10, %s584_s16, 1  ;;  %vm216_vm0 = vcmask 261120  }
  0x16   : > { %226 = vmatpush.bf16.msra.mxu0 %v413_v3  ;;  %v405_v11 = vor.u32 %v430_v8, %v402_v9  ;;  %v176_v13 = vld [vmem:[%s696_s2] sm:$0x7]  ;;  %v435_v25 = vld [vmem:[%s695_s1 + $0x28] sm:$0xf0]  ;;  %v408_v26 = vld [vmem:[%s695_s1 + $0x8] sm:$0xf]  ;;  %p497_p12 = pnand %p496_p11, %p601_p5  ;;  %p502_p2 = por %p501_p1, %p500_p0 }
  0x17   : > { %239 = vmatpush.bf16.msra.mxu1 %v417_v7  ;;  %s397_s20 = sshll.u32 %s163_s19, 2  ;;  %v178_v14 = vperm.slane %v176_v13, 0  ;;  %v179_v15 = vperm.slane %v176_v13, 1  ;;  %v420_v24 = vld [vmem:[%s695_s1 + $0x20] sm:$0xf]  ;;  %vm282_vm1 = vcmask 64512  }
  0x18   : > { %s165_s26 = scalar_lea.vmem %s694_s0, %s397_s20  ;;  %v421_v27 = vor.u32 %v435_v25, %v420_v24  ;;  %v432_v28 = vld [vmem:[%s695_s1 + $0x10] sm:$0xf0]  ;;  %v180_v33 = vperm.slane %v176_v13, 2  ;;  %vm299_vm2 = vcmask 1043456   ;;  %v278_v41 = vshrl.u32 %v277_v37, 7  ;;  %p498_p13 = pneg %p497_p12 }
  0x19   : > { %v167_v12 = vld [vmem:[%s165_s26] sm:$0xf]  ;;  %v409_v29 = vor.u32 %v432_v28, %v408_v26  ;;  %v280_v42 = vand.u32 127, %v277_v37  ;;  %s330_s26 = sshll.u32 %s161_s25, 4  ;;  %s331_s26 = int_to_ptr.vmem [resolvable:$true] %s330_s26 }
  0x1a   : > { %227 = vmatpush.bf16.msra.mxu0 %v401_v10  ;;  %252 = vmatpush.bf16.msra.mxu2 %v421_v27  ;;  %p503_p3 = pnand %p502_p2, %p498_p13 }
  0x1b   : > { %240 = vmatpush.bf16.msra.mxu1 %v405_v11  ;;  %vm281_vm3 = vcmp.le.s32.totalorder %v280_v42, %v278_v41 }
  0x1d   : > { %422 = vmatmul.msk.bf16.vlgmr.msra.gmra.mxu0 %vm216_vm0, %v167_v12 }
  0x1e   : > { %423 = vmatmul.msk.bf16.vlgmr.msra.gmra.mxu1 %vm216_vm0, %v167_v12  ;;  %253 = vmatpush.bf16.msra.mxu2 %v409_v29 }
  0x21   : > { %424 = vmatmul.msk.bf16.vlgmr.msra.gmra.mxu2 %vm216_vm0, %v167_v12 }
  0x9a   : > { %v229_v16 = vpop.f32.mrf.mxu0 }
  0x9b   : > { %v230_v17 = vadd.f32 %v229_v16, %v178_v14  ;;  %v242_v18 = vpop.f32.mrf.mxu1 }
  0x9c   : > { %v243_v19 = vadd.f32 %v242_v18, %v179_v15 }
  0x9e   : > { %v259_v20 = vpack.c.bf16 %v243_v19, %v230_v17 }
  0xa0   : > { %271 = vmatpush.bf16.xpose.msra.mxu3 %v259_v20  ;;  %v262_v23 = vrot.slane %v259_v20, 4 }
  0xa2   : > { %v231_v21 = vpop.f32.mrf.mxu0 }
  0xa3   : > { %v244_v22 = vpop.f32.mrf.mxu1 }
  0xa4   : > { %v255_v35 = vpop.f32.mrf.mxu2 }
  0xa5   : > { %v256_v38 = vadd.f32 %v255_v35, %v180_v33 }
  0xa7   : > { %272 = vmatmul.bf16.vlgmr.msra.gmra.mxu3 %v262_v23  ;;  %v260_v40 = vpack.c.bf16 %v256_v38, %v256_v38 }
  0xa9   : > { %v301_v43 = vsel %vm299_vm2, %v260_v40, 0 }
  0xaa   : > { %310 = vmatpush.bf16.msrb.mxu0 %v301_v43 }
  0xac   : > { %v257_v44 = vpop.f32.mrf.mxu2 }
 0x12a   : > { %v273_v30 = vpop.f32.mrf.mxu3 }
 0x12b   : > { %v283_v31 = vsel %vm282_vm1, %v273_v30, -inf }
 0x12c   : > { %284 = vmax.xlane.f32.xlu0 %v283_v31 }
 0x132   : > { %v275_v32 = vpop.f32.mrf.mxu3 }
 0x19f   : > { %v285_v34 = vpop.xlane.xlu0 %284 }
 0x1a0   : > { %v286_v36 = vsub.f32 %v273_v30, %v285_v34 }
 0x1a2   : > { %v287_v39 = vmul.f32 1.442695, %v286_v36 }
 0x1a4   : > { %475 = vpow2.f32 %v287_v39 }
 0x1aa   : > { %v476_v45 = vpop.eup %475 }
 0x1ab   : > { %v289_v46 = vsel %vm281_vm3, %v476_v45, 0.0 }
 0x1ac   : > { %v290_v47 = vsel %vm282_vm1, %v289_v46, 0.0 }
 0x1ad   : > { %291 = vadd.xlane.f32.xlu0 %v290_v47 }
 0x220   : > { %v292_v48 = vpop.xlane.xlu0 %291 }
 0x221   : > { %477 = vrcp.f32 %v292_v48 }
 0x227   : > { %v478_v49 = vpop.eup %477 }
 0x228   : > { %v294_v50 = vmul.f32 %v478_v49, %v289_v46 }
 0x22a   : > { %v295_v51 = vpack.c.bf16 %v294_v50, %v294_v50 }
 0x22c   : > { %425 = vmatmul.msk.bf16.vlgmr.msrb.gmra.mxu0 %vm282_vm1, %v295_v51 }
 0x2a9   : > { %v312_v52 = vpop.f32.mrf.mxu0 }
 0x2aa   : > { %316 = vst.msk [vmem:[%s161_s25] sm:$0xff] %vm216_vm0, %v312_v52 }
 0x2ab   : > { %506 = shalt.err (!%p503_p3)
}
 0x2ac   : > { %436 = dma.vmem_to_hbm [thread:$0]  (%p601_p5), %s331_s26, 128, %s333_s27, %s318_s28  }
 0x2b1   : > { %v314_v53 = vpop.f32.mrf.mxu0 }
 0x2b2 PF: > { %p442_p4 = scmp.ge.s32.totalorder %s541_s15, 2  ;;  %s344_s8 = sand.u32 1, %s529_s12  }
 0x2b3   : > { %s345_s9 = scalar_lea.sflag [#allocation3], %s344_s8 }
 0x2b4   : > { %p439_p7 = pnand %p442_p4, %p605_p6 }
 0x2b6   : > { %p440_p8 = pneg %p439_p7 }
 0x2b8   : > { %524 = dma.done.wait (%p440_p8), %s345_s9, 128  }
 0x2b9   : > { %526 = vsyncadd (%p440_p8), %s345_s9, 4294967168  ;;  %p13_p9 = scmp.ge.s32.totalorder %s588_s18, 4   ;;  %s700_s12 = smov %s533_s13 }
 0x2ba   : > { %s701_s13 = smov %s537_s14  ;;  %s702_s14 = smov %s599_s21 }
 0x2bb   : > { %s703_s15 = smov %s588_s18  ;;  %15 = sbr.rel (!%p13_p9) target bundleno = 3 (0x3), region = 67 }
 0x2c0   :  { %351 = vsyncpa [#allocation3], 1 }
 0x2c1   :  { %353 = vsyncpa [#allocation3 + $0x1], 1 }

</bundles_post_ra>
